<compile_context>
chip_gen: v7x
topology: tpu7x:2x2x1
jax: 0.10.0
libtpu: 0.0.40
codegen_flags: <defaults>
</compile_context>

<pallas_src>
import math

import jax
import jax.numpy as jnp
from jax.experimental import pallas as pl
from jax.experimental.pallas import tpu as pltpu

_INV_SQRT2 = 1.0 / math.sqrt(2.0)


def _round_up(x, m):
    return ((x + m - 1) // m) * m


def _gelu_f32(h):
    # Exact GELU (erf form) == nn.GELU() default.
    return 0.5 * h * (1.0 + jax.lax.erf(h * _INV_SQRT2))


def _ffn_kernel_fused(x_ref, w1_ref, b1_ref, w2_ref, b2_ref, o_ref):
    """Single ffn step per row tile: no accumulator scratch needed."""
    h = jnp.dot(x_ref[...], w1_ref[...], preferred_element_type=jnp.float32)
    g = _gelu_f32(h + b1_ref[...])
    out = jnp.dot(g.astype(w2_ref.dtype), w2_ref[...],
                  preferred_element_type=jnp.float32)
    o_ref[...] = (out + b2_ref[...]).astype(o_ref.dtype)


def _ffn_kernel_acc(x_ref, w1_ref, b1_ref, w2_ref, b2_ref, o_ref, acc_ref):
    """Tiled ffn axis (grid axis 1, last): partial products accumulate in f32."""
    j = pl.program_id(1)

    h = jnp.dot(x_ref[...], w1_ref[...], preferred_element_type=jnp.float32)
    g = _gelu_f32(h + b1_ref[...])
    part = jnp.dot(g.astype(w2_ref.dtype), w2_ref[...],
                   preferred_element_type=jnp.float32)

    @pl.when(j == 0)
    def _():
        acc_ref[...] = part

    @pl.when(j > 0)
    def _():
        acc_ref[...] += part

    @pl.when(j == pl.num_programs(1) - 1)
    def _():
        o_ref[...] = (acc_ref[...] + b2_ref[...]).astype(o_ref.dtype)


def ffn_pallas(x, w1, b1, w2, b2, *, tm=256, tn=512, compute_dtype=None,
               vmem_budget_bytes=40 * 1024 * 1024):
    """Feed-forward network: gelu(x @ w1 + b1) @ w2 + b2.

    x:  (..., hidden)
    w1: (hidden, ffn)  (= layer1.weight.T)
    b1: (ffn,)
    w2: (ffn, hidden)  (= layer2.weight.T)
    b2: (hidden,)
    compute_dtype: optional dtype (e.g. jnp.bfloat16) for matmul operands;
                   accumulation, bias adds and GELU stay in f32.
    """
    orig_shape = x.shape
    orig_dtype = x.dtype
    hidden = orig_shape[-1]
    ffn = w1.shape[1]

    x2d = x.reshape(-1, hidden)
    M = x2d.shape[0]

    # Lane-dense padded dims (multiples of 128) -> unmasked full-lane stores.
    Hp = _round_up(hidden, 128)
    Fp = _round_up(ffn, 128)

    cdtype = jnp.dtype(compute_dtype) if compute_dtype is not None else jnp.dtype(x.dtype)
    in_isz = cdtype.itemsize
    out_isz = jnp.dtype(orig_dtype).itemsize

    tm_eff = min(_round_up(tm, 128), _round_up(M, 128))
    tn_cap = min(_round_up(tn, 128), Fp)

    def vmem_usage(tm_, tn_):
        # Double-buffered inputs/outputs + f32 accumulator (only if ffn is tiled).
        return (2 * tm_ * Hp * in_isz           # x tile
                + 2 * Hp * tn_ * in_isz         # W1 tile
                + 2 * tn_ * Hp * in_isz         # W2 tile
                + 2 * 8 * tn_ * 4               # b1 (sublane-padded)
                + 2 * 8 * Hp * 4                # b2
                + (tm_ * Hp * 4 if tn_ < Fp else 0)   # f32 accumulator scratch
                + 2 * tm_ * Hp * out_isz)       # output tile

    # Prefer a single fused ffn step per row tile if the weights fit the budget;
    # otherwise shrink the ffn tile (then the row tile) in 128-multiples.
    if vmem_usage(tm_eff, Fp) <= vmem_budget_bytes:
        tn_eff = Fp
    else:
        tn_eff = tn_cap
        while tn_eff > 128 and vmem_usage(tm_eff, tn_eff) > vmem_budget_bytes:
            tn_eff = max(128, _round_up(tn_eff // 2, 128))
        while tm_eff > 128 and vmem_usage(tm_eff, tn_eff) > vmem_budget_bytes:
            tm_eff = max(128, _round_up(tm_eff // 2, 128))

    n_row = pl.cdiv(M, tm_eff)
    n_ffn = pl.cdiv(Fp, tn_eff)
    Mp = n_row * tm_eff
    Fpad = n_ffn * tn_eff

    def pad2(a, r, c):
        return jnp.pad(a, ((0, r), (0, c))) if (r or c) else a

    def pad1(a, p):
        return jnp.pad(a, ((0, p),)) if p else a

    # Zero padding contributes exactly 0 to every matmul / bias / GELU term.
    x_p = pad2(x2d, Mp - M, Hp - hidden)
    w1_p = pad2(w1, Hp - hidden, Fpad - ffn)
    w2_p = pad2(w2, Fpad - ffn, Hp - hidden)
    b1_p = pad1(b1, Fpad - ffn).reshape(1, Fpad).astype(jnp.float32)
    b2_p = pad1(b2, Hp - hidden).reshape(1, Hp).astype(jnp.float32)

    if compute_dtype is not None:
        x_p = x_p.astype(compute_dtype)
        w1_p = w1_p.astype(compute_dtype)
        w2_p = w2_p.astype(compute_dtype)

    vmem_est = vmem_usage(tm_eff, tn_eff)
    vmem_limit = int(min(max(int(vmem_est * 1.5), 32 * 1024 * 1024),
                         100 * 1024 * 1024))

    cost = pl.CostEstimate(
        flops=int(4 * Mp * Hp * Fpad),
        transcendentals=int(Mp * Fpad),
        bytes_accessed=int(
            Mp * Hp * in_isz          # x
            + Hp * Fpad * in_isz      # W1
            + Fpad * Hp * in_isz      # W2
            + Fpad * 4 + Hp * 4       # biases
            + Mp * Hp * out_isz       # out
        ),
    )

    if n_ffn == 1:
        kernel = _ffn_kernel_fused
        grid = (n_row,)
        in_specs = [
            pl.BlockSpec((tm_eff, Hp), lambda i: (i, 0)),    # x rows
            pl.BlockSpec((Hp, Fpad), lambda i: (0, 0)),      # full W1 (resident)
            pl.BlockSpec((1, Fpad), lambda i: (0, 0)),       # b1
            pl.BlockSpec((Fpad, Hp), lambda i: (0, 0)),      # full W2 (resident)
            pl.BlockSpec((1, Hp), lambda i: (0, 0)),         # b2
        ]
        out_specs = pl.BlockSpec((tm_eff, Hp), lambda i: (i, 0))
        scratch_shapes = []
        dim_sem = ("parallel",)
    else:
        kernel = _ffn_kernel_acc
        grid = (n_row, n_ffn)                                # reduction axis last
        in_specs = [
            pl.BlockSpec((tm_eff, Hp), lambda i, j: (i, 0)),     # x rows (resident over j)
            pl.BlockSpec((Hp, tn_eff), lambda i, j: (0, j)),     # W1 cols
            pl.BlockSpec((1, tn_eff), lambda i, j: (0, j)),      # b1
            pl.BlockSpec((tn_eff, Hp), lambda i, j: (j, 0)),     # W2 rows
            pl.BlockSpec((1, Hp), lambda i, j: (0, 0)),          # b2
        ]
        out_specs = pl.BlockSpec((tm_eff, Hp), lambda i, j: (i, 0))
        scratch_shapes = [pltpu.VMEM((tm_eff, Hp), jnp.float32)]
        dim_sem = ("parallel", "arbitrary")

    out = pl.pallas_call(
        kernel,
        out_shape=jax.ShapeDtypeStruct((Mp, Hp), orig_dtype),
        grid_spec=pltpu.PrefetchScalarGridSpec(
            num_scalar_prefetch=0,
            grid=grid,
            in_specs=in_specs,
            out_specs=out_specs,
            scratch_shapes=scratch_shapes,
        ),
        compiler_params=pltpu.CompilerParams(
            dimension_semantics=dim_sem,
            vmem_limit_bytes=vmem_limit,
        ),
        cost_estimate=cost,
    )(x_p, w1_p, b1_p, w2_p, b2_p)

    return out[:M, :hidden].reshape(orig_shape)


def ffn_reference(x, w1, b1, w2, b2):
    h = x @ w1 + b1
    g = 0.5 * h * (1.0 + jax.lax.erf(h * _INV_SQRT2))
    return g @ w2 + b2


if __name__ == "__main__":
    # Small shapes consistent with the module: batch=2, seq=8, hidden=32, ffn=64.
    batch, seq, hidden, ffn = 2, 8, 32, 64

    key = jax.random.PRNGKey(0)
    kx, kw1, kb1, kw2, kb2 = jax.random.split(key, 5)

    x = jax.random.normal(kx, (batch, seq, hidden), dtype=jnp.float32)

    # Deterministic params mimicking nn.Linear's uniform(-1/sqrt(in), 1/sqrt(in)).
    lim1 = 1.0 / math.sqrt(hidden)
    lim2 = 1.0 / math.sqrt(ffn)
    w1 = jax.random.uniform(kw1, (hidden, ffn), jnp.float32, -lim1, lim1)
    b1 = jax.random.uniform(kb1, (ffn,), jnp.float32, -lim1, lim1)
    w2 = jax.random.uniform(kw2, (ffn, hidden), jnp.float32, -lim2, lim2)
    b2 = jax.random.uniform(kb2, (hidden,), jnp.float32, -lim2, lim2)

    ref = ffn_reference(x, w1, b1, w2, b2)

    # f32 operand path (single fused step): bit-for-bit comparable to erf reference.
    out_f32 = jax.block_until_ready(ffn_pallas(x, w1, b1, w2, b2))
    assert out_f32.shape == x.shape
    assert jnp.allclose(out_f32, ref, atol=1e-5, rtol=1e-5), "f32 mismatch vs reference"

    # bf16 matmul operands (f32 accumulation / bias / GELU): looser tolerance.
    out_bf16 = jax.block_until_ready(
        ffn_pallas(x, w1, b1, w2, b2, compute_dtype=jnp.bfloat16)
    )
    assert out_bf16.shape == x.shape
    assert jnp.allclose(out_bf16, ref, atol=5e-2, rtol=5e-2), "bf16 mismatch vs reference"

    # Ragged row count (exercises cdiv grid + padding path).
    x_odd = jax.random.normal(kx, (2, 7, hidden), dtype=jnp.float32)
    out_odd = jax.block_until_ready(ffn_pallas(x_odd, w1, b1, w2, b2))
    assert jnp.allclose(out_odd, ffn_reference(x_odd, w1, b1, w2, b2),
                        atol=1e-5, rtol=1e-5), "odd-M mismatch vs reference"

    # Force the tiled-ffn accumulator path (vmem_budget_bytes=0 -> tn shrinks to 128,
    # ffn=256 -> 2 reduction steps) to exercise the pl.when init/finalize kernel.
    ffn_big = 256
    kw1b, kb1b, kw2b, kb2b = jax.random.split(kw2, 4)
    lim2b = 1.0 / math.sqrt(ffn_big)
    w1b = jax.random.uniform(kw1b, (hidden, ffn_big), jnp.float32, -lim1, lim1)
    b1b = jax.random.uniform(kb1b, (ffn_big,), jnp.float32, -lim1, lim1)
    w2b = jax.random.uniform(kw2b, (ffn_big, hidden), jnp.float32, -lim2b, lim2b)
    b2b = jax.random.uniform(kb2b, (hidden,), jnp.float32, -lim2b, lim2b)
    out_acc = jax.block_until_ready(
        ffn_pallas(x, w1b, b1b, w2b, b2b, vmem_budget_bytes=0)
    )
    assert jnp.allclose(out_acc, ffn_reference(x, w1b, b1b, w2b, b2b),
                        atol=1e-5, rtol=1e-5), "tiled-ffn mismatch vs reference"

    print("KERNEL_OK")
</pallas_src>

<mosaic_0001>
module attributes {stable_mosaic.version = 11 : i64} {
  func.func @_ffn_kernel_fused(%arg0: i32, %arg1: memref<128x128xf32, #tpu.memory_space<vmem>>, %arg2: memref<128x128xf32, #tpu.memory_space<vmem>>, %arg3: memref<1x128xf32, #tpu.memory_space<vmem>>, %arg4: memref<128x128xf32, #tpu.memory_space<vmem>>, %arg5: memref<1x128xf32, #tpu.memory_space<vmem>>, %arg6: memref<128x128xf32, #tpu.memory_space<vmem>>) attributes {dimension_semantics = [#tpu.dimension_semantics<parallel>], iteration_bounds = array<i64: 1>, scalar_prefetch = 0 : i64, scratch_operands = 0 : i64, tpu.core_type = #tpu.core_type<tc>, window_params = [{transform_indices = @transform_0, window_bounds = array<i64: 128, 128>}, {pipeline_mode = #tpu.pipeline_mode<synchronous>, transform_indices = @transform_1, window_bounds = array<i64: 128, 128>}, {pipeline_mode = #tpu.pipeline_mode<synchronous>, transform_indices = @transform_2, window_bounds = array<i64: 1, 128>}, {pipeline_mode = #tpu.pipeline_mode<synchronous>, transform_indices = @transform_3, window_bounds = array<i64: 128, 128>}, {pipeline_mode = #tpu.pipeline_mode<synchronous>, transform_indices = @transform_4, window_bounds = array<i64: 1, 128>}, {transform_indices = @transform_5, window_bounds = array<i64: 128, 128>}]} {
    %c0 = arith.constant 0 : index
    %c0_0 = arith.constant 0 : index
    %0 = vector.load %arg1[%c0, %c0_0] : memref<128x128xf32, #tpu.memory_space<vmem>>, vector<128x128xf32>
    %c0_1 = arith.constant 0 : index
    %c0_2 = arith.constant 0 : index
    %1 = vector.load %arg2[%c0_1, %c0_2] : memref<128x128xf32, #tpu.memory_space<vmem>>, vector<128x128xf32>
    %cst = arith.constant dense<0.000000e+00> : vector<128x128xf32>
    %2 = tpu.matmul %0, %1, %cst {dimension_numbers = #tpu.dot_dimension_numbers<[1], [0], [0], [1], [0, 0, 1, 1], [], []>} : vector<128x128xf32>, vector<128x128xf32>, vector<128x128xf32> -> vector<128x128xf32>
    %c0_3 = arith.constant 0 : index
    %c0_4 = arith.constant 0 : index
    %3 = vector.load %arg3[%c0_3, %c0_4] : memref<1x128xf32, #tpu.memory_space<vmem>>, vector<1x128xf32>
    %4 = vector.broadcast %3 : vector<1x128xf32> to vector<128x128xf32>
    %5 = arith.addf %2, %4 : vector<128x128xf32>
    %cst_5 = arith.constant 5.000000e-01 : f32
    %6 = vector.broadcast %cst_5 : f32 to vector<128x128xf32>
    %7 = arith.mulf %6, %5 : vector<128x128xf32>
    %cst_6 = arith.constant 0.707106769 : f32
    %8 = vector.broadcast %cst_6 : f32 to vector<128x128xf32>
    %9 = arith.mulf %5, %8 : vector<128x128xf32>
    %10 = math.erf %9 : vector<128x128xf32>
    %cst_7 = arith.constant 1.000000e+00 : f32
    %11 = vector.broadcast %cst_7 : f32 to vector<128x128xf32>
    %12 = arith.addf %11, %10 : vector<128x128xf32>
    %13 = arith.mulf %7, %12 : vector<128x128xf32>
    %c0_8 = arith.constant 0 : index
    %c0_9 = arith.constant 0 : index
    %14 = vector.load %arg4[%c0_8, %c0_9] : memref<128x128xf32, #tpu.memory_space<vmem>>, vector<128x128xf32>
    %cst_10 = arith.constant dense<0.000000e+00> : vector<128x128xf32>
    %15 = tpu.matmul %13, %14, %cst_10 {dimension_numbers = #tpu.dot_dimension_numbers<[1], [0], [0], [1], [0, 0, 1, 1], [], []>} : vector<128x128xf32>, vector<128x128xf32>, vector<128x128xf32> -> vector<128x128xf32>
    %c0_11 = arith.constant 0 : index
    %c0_12 = arith.constant 0 : index
    %16 = vector.load %arg5[%c0_11, %c0_12] : memref<1x128xf32, #tpu.memory_space<vmem>>, vector<1x128xf32>
    %17 = vector.broadcast %16 : vector<1x128xf32> to vector<128x128xf32>
    %18 = arith.addf %15, %17 : vector<128x128xf32>
    %c0_13 = arith.constant 0 : index
    %c0_14 = arith.constant 0 : index
    %19 = vector.load %arg6[%c0_13, %c0_14] : memref<128x128xf32, #tpu.memory_space<vmem>>, vector<128x128xf32>
    tpu.vector_store %arg6[%c0_13, %c0_14], %18 {strides = array<i32>} : memref<128x128xf32, #tpu.memory_space<vmem>>, vector<128x128xf32>,
    return
  }
  func.func @transform_0(%arg0: i32) -> (i32, i32) {
    %c0_i32 = arith.constant 0 : i32
    %c0_i32_0 = arith.constant 0 : i32
    return %arg0, %c0_i32 : i32, i32
  }
  func.func @transform_1(%arg0: i32) -> (i32, i32) {
    %c0_i32 = arith.constant 0 : i32
    %c0_i32_0 = arith.constant 0 : i32
    %c0_i32_1 = arith.constant 0 : i32
    return %c0_i32, %c0_i32_0 : i32, i32
  }
  func.func @transform_2(%arg0: i32) -> (i32, i32) {
    %c0_i32 = arith.constant 0 : i32
    %c0_i32_0 = arith.constant 0 : i32
    %c0_i32_1 = arith.constant 0 : i32
    return %c0_i32, %c0_i32_0 : i32, i32
  }
  func.func @transform_3(%arg0: i32) -> (i32, i32) {
    %c0_i32 = arith.constant 0 : i32
    %c0_i32_0 = arith.constant 0 : i32
    %c0_i32_1 = arith.constant 0 : i32
    return %c0_i32, %c0_i32_0 : i32, i32
  }
  func.func @transform_4(%arg0: i32) -> (i32, i32) {
    %c0_i32 = arith.constant 0 : i32
    %c0_i32_0 = arith.constant 0 : i32
    %c0_i32_1 = arith.constant 0 : i32
    return %c0_i32, %c0_i32_0 : i32, i32
  }
  func.func @transform_5(%arg0: i32) -> (i32, i32) {
    %c0_i32 = arith.constant 0 : i32
    %c0_i32_0 = arith.constant 0 : i32
    return %arg0, %c0_i32 : i32, i32
  }
}

</mosaic_0001>

<bundles_post_ra>
// kernel: tpu_custom_call.1
= control target key start
LH: loop header
LB: loop body
LE: loop exit
PB: predicated region body
PF: predicated region fallthrough
CT: control target
= control target key end

     0   :  { %10 = vsyncpa [#allocation3], 0  ;;  %s1041_s0 = inlined_call_operand.hbm [shape: f32[128,128], index: 0, kind: input, shape index: {}]   ;;  %s1042_s1 = inlined_call_operand.hbm [shape: f32[128,128], index: 1, kind: input, shape index: {}]   ;;  %s1043_s2 = inlined_call_operand.vmem [shape: f32[1,128], index: 2, kind: input, shape index: {}]   ;;  %s1044_s3 = inlined_call_operand.hbm [shape: f32[128,128], index: 3, kind: input, shape index: {}]   ;;  %s1045_s4 = inlined_call_operand.vmem [shape: f32[1,128], index: 4, kind: input, shape index: {}]   ;;  %s1046_s5 = inlined_call_operand.hbm [shape: f32[128,128], index: 5, kind: output, shape index: {}]  }
   0x1   :  { %11 = vsyncpa [#allocation6], 0 }
   0x2   :  { %12 = vsyncpa [#allocation4], 0  ;;  %s902_s18 = smov [#allocation5]   ;;  %s903_s20 = smov [#allocation2]  }
   0x3   :  { %s30_s19 = sshll.u32 %s902_s18, 4  ;;  %s18_s21 = sshll.u32 %s903_s20, 4  ;;  %s31_s19 = int_to_ptr.vmem [resolvable:$true] %s30_s19  ;;  %s938_s21 = int_to_ptr.vmem [resolvable:$true] %s18_s21 }
   0x4   :  { %s808_s24 = scalar_lea.hbm %s1042_s1, 2048 }
   0x5   :  { %p809_p0 = scmp.ne.s32.totalorder %s1042_s1, %s808_s24  ;;  %p812_p1 = scmp.lt.u32.totalorder %s808_s24, %s1042_s1 }
   0x7   :  { %p814_p2 = pnand %p812_p1, %p809_p0 }
   0x9   :  { %817 = shalt.err (!%p814_p2)
}
   0xa   :  { %s818_s29 = scalar_lea.vmem %s31_s19, 2048  ;;  %p823_p4 = scmp.lt.s32.totalorder %s31_s19, %s31_s19 }
   0xb   :  { %p819_p3 = scmp.ne.s32.totalorder %s31_s19, %s818_s29  ;;  %p824_p5 = scmp.lt.s32.totalorder %s818_s29, %s818_s29 }
   0xd   :  { %p825_p6 = por %p824_p5, %p823_p4 }
   0xf   :  { %p826_p7 = pnand %p825_p6, %p819_p3 }
  0x11   :  { %829 = shalt.err (!%p826_p7)
}
  0x12   :  { %s904_s30 = smov 128   ;;  %s905_s6 = smov 8  }
  0x13   :  { %36 = dma.hbm_to_vmem [thread:$0]  %s1042_s1, 2048, %s31_s19, [#allocation6], %s904_s30, %s904_s30, %s905_s6  }
  0x14   :  { %s830_s11 = scalar_lea.hbm %s1041_s0, 2048 }
  0x15   :  { %p831_p8 = scmp.ne.s32.totalorder %s1041_s0, %s830_s11  ;;  %p834_p9 = scmp.lt.u32.totalorder %s830_s11, %s1041_s0 }
  0x17   :  { %p836_p10 = pnand %p834_p9, %p831_p8 }
  0x19   :  { %839 = shalt.err (!%p836_p10)
}
  0x1a   :  { %s840_s16 = scalar_lea.vmem %s938_s21, 2048  ;;  %p845_p12 = scmp.lt.s32.totalorder %s938_s21, %s938_s21 }
  0x1b   :  { %p841_p11 = scmp.ne.s32.totalorder %s938_s21, %s840_s16  ;;  %p846_p13 = scmp.lt.s32.totalorder %s840_s16, %s840_s16 }
  0x1d   :  { %p847_p0 = por %p846_p13, %p845_p12 }
  0x1f   :  { %p848_p1 = pnand %p847_p0, %p841_p11 }
  0x21   :  { %851 = shalt.err (!%p848_p1)
}
  0x22   :  { %24 = dma.hbm_to_vmem [thread:$0]  %s1041_s0, 2048, %s938_s21, [#allocation3], %s904_s30, %s904_s30, %s905_s6  }
  0x23   :  { %s906_s18 = smov [#allocation7]   ;;  %s852_s23 = scalar_lea.hbm %s1044_s3, 2048 }
  0x24   :  { %s44_s19 = sshll.u32 %s906_s18, 4  ;;  %p853_p2 = scmp.ne.s32.totalorder %s1044_s3, %s852_s23  ;;  %s45_s19 = int_to_ptr.vmem [resolvable:$true] %s44_s19 }
  0x25   :  { %p856_p3 = scmp.lt.u32.totalorder %s852_s23, %s1044_s3 }
  0x27   :  { %p858_p4 = pnand %p856_p3, %p853_p2 }
  0x29   :  { %861 = shalt.err (!%p858_p4)
}
  0x2a   :  { %s862_s28 = scalar_lea.vmem %s45_s19, 2048  ;;  %p867_p6 = scmp.lt.s32.totalorder %s45_s19, %s45_s19 }
  0x2b   :  { %p863_p5 = scmp.ne.s32.totalorder %s45_s19, %s862_s28  ;;  %p868_p7 = scmp.lt.s32.totalorder %s862_s28, %s862_s28 }
  0x2d   :  { %p869_p8 = por %p868_p7, %p867_p6 }
  0x2f   :  { %p870_p9 = pnand %p869_p8, %p863_p5 }
  0x31   :  { %873 = shalt.err (!%p870_p9)
}
  0x32   :  { %50 = dma.hbm_to_vmem [thread:$0]  %s1044_s3, 2048, %s45_s19, [#allocation6], %s904_s30, %s904_s30, %s905_s6  }
  0x33   :  { %896 = dma.done.wait [#allocation3], 2048  }
  0x34   :  { %897 = vsyncadd [#allocation3], 4294965248 }
  0x35   :  { %898 = dma.done.wait [#allocation6], 4096  }
  0x36   :  { %899 = vsyncadd [#allocation6], 4294963200  ;;  %v78_v0 = vld [vmem:[#allocation5] sm:$0xff]  ;;  %v79_v1 = vld [vmem:[#allocation5 + $0x8] sm:$0xff] }
  0x37   :  { %v80_v2 = vld [vmem:[#allocation5 + $0x10] sm:$0xff]  ;;  %v706_v3 = vpack.c.bf16 %v79_v1, %v78_v0  ;;  %v81_v4 = vld [vmem:[#allocation5 + $0x18] sm:$0xff]  ;;  %v82_v6 = vld [vmem:[#allocation5 + $0x20] sm:$0xff] }
  0x38   :  { %v710_v5 = vpack.c.bf16 %v81_v4, %v80_v2  ;;  %v83_v7 = vld [vmem:[#allocation5 + $0x28] sm:$0xff]  ;;  %v62_v9 = vld [vmem:[#allocation2] sm:$0xff]  ;;  %v84_v10 = vld [vmem:[#allocation5 + $0x30] sm:$0xff] }
  0x39   :  { %707 = vmatprep.subr.bf16.mxu0 %v706_v3  ;;  %v714_v8 = vpack.c.bf16 %v83_v7, %v82_v6  ;;  %v85_v11 = vld [vmem:[#allocation5 + $0x38] sm:$0xff]  ;;  %626 = vmatprep.mubr.f32.mxu0 %v62_v9  ;;  %v86_v13 = vld [vmem:[#allocation5 + $0x40] sm:$0xff]  ;;  %v87_v14 = vld [vmem:[#allocation5 + $0x48] sm:$0xff] }
  0x3a   :  { %709 = vmatpush3.bf16.msra.mxu0 %v706_v3  ;;  %v718_v12 = vpack.c.bf16 %v85_v11, %v84_v10  ;;  %v326_v15 = vld [vmem:[#allocation7] sm:$0xff]  ;;  %v327_v16 = vld [vmem:[#allocation7 + $0x8] sm:$0xff]  ;;  %v328_v17 = vld [vmem:[#allocation7 + $0x10] sm:$0xff]  ;;  %v722_v21 = vpack.c.bf16 %v87_v14, %v86_v13 }
  0x3b   :  { %711 = vmatprep.subr.bf16.mxu0 %v710_v5  ;;  %v329_v18 = vld [vmem:[#allocation7 + $0x18] sm:$0xff]  ;;  %v738_v19 = vpack.c.bf16 %v327_v16, %v326_v15  ;;  %v330_v22 = vld [vmem:[#allocation7 + $0x20] sm:$0xff]  ;;  %v331_v23 = vld [vmem:[#allocation7 + $0x28] sm:$0xff] }
  0x3c   :  { %v742_v20 = vpack.c.bf16 %v329_v18, %v328_v17  ;;  %v88_v24 = vld [vmem:[#allocation5 + $0x50] sm:$0xff]  ;;  %v89_v25 = vld [vmem:[#allocation5 + $0x58] sm:$0xff]  ;;  %v746_v26 = vpack.c.bf16 %v331_v23, %v330_v22  ;;  %v90_v28 = vld [vmem:[#allocation5 + $0x60] sm:$0xff] }
  0x3d   :  { %739 = vmatprep.subr.bf16.mxu1 %v738_v19  ;;  %v726_v27 = vpack.c.bf16 %v89_v25, %v88_v24  ;;  %v91_v29 = vld [vmem:[#allocation5 + $0x68] sm:$0xff]  ;;  %v92_v31 = vld [vmem:[#allocation5 + $0x70] sm:$0xff]  ;;  %v93_v32 = vld [vmem:[#allocation5 + $0x78] sm:$0xff] }
  0x3e   :  { %713 = vmatpush3.bf16.msra.mxu0 %v710_v5  ;;  %741 = vmatpush3.bf16.msra.mxu1 %v738_v19  ;;  %v730_v30 = vpack.c.bf16 %v91_v29, %v90_v28  ;;  %v734_v33 = vpack.c.bf16 %v93_v32, %v92_v31  ;;  %v63_v34 = vld [vmem:[#allocation2 + $0x8] sm:$0xff]  ;;  %v64_v35 = vld [vmem:[#allocation2 + $0x10] sm:$0xff]  ;;  %v65_v36 = vld [vmem:[#allocation2 + $0x18] sm:$0xff] }
  0x3f   :  { %715 = vmatprep.subr.bf16.mxu0 %v714_v8  ;;  %743 = vmatprep.subr.bf16.mxu1 %v742_v20  ;;  %v66_v37 = vld [vmem:[#allocation2 + $0x20] sm:$0xff]  ;;  %v67_v38 = vld [vmem:[#allocation2 + $0x28] sm:$0xff]  ;;  %v68_v39 = vld [vmem:[#allocation2 + $0x30] sm:$0xff] }
  0x40   :  { %v69_v40 = vld [vmem:[#allocation2 + $0x38] sm:$0xff]  ;;  %v70_v41 = vld [vmem:[#allocation2 + $0x40] sm:$0xff]  ;;  %v71_v42 = vld [vmem:[#allocation2 + $0x48] sm:$0xff] }
  0x41   :  { %v72_v43 = vld [vmem:[#allocation2 + $0x50] sm:$0xff]  ;;  %v73_v44 = vld [vmem:[#allocation2 + $0x58] sm:$0xff]  ;;  %v74_v45 = vld [vmem:[#allocation2 + $0x60] sm:$0xff] }
  0x42   :  { %717 = vmatpush3.bf16.msra.mxu0 %v714_v8  ;;  %745 = vmatpush3.bf16.msra.mxu1 %v742_v20  ;;  %v75_v46 = vld [vmem:[#allocation2 + $0x68] sm:$0xff]  ;;  %v76_v47 = vld [vmem:[#allocation2 + $0x70] sm:$0xff]  ;;  %v77_v48 = vld [vmem:[#allocation2 + $0x78] sm:$0xff] }
  0x43   :  { %719 = vmatprep.subr.bf16.mxu0 %v718_v12  ;;  %747 = vmatprep.subr.bf16.mxu1 %v746_v26  ;;  %v332_v49 = vld [vmem:[#allocation7 + $0x30] sm:$0xff]  ;;  %v333_v50 = vld [vmem:[#allocation7 + $0x38] sm:$0xff]  ;;  %v334_v52 = vld [vmem:[#allocation7 + $0x40] sm:$0xff] }
  0x44   :  { %v750_v51 = vpack.c.bf16 %v333_v50, %v332_v49  ;;  %v335_v53 = vld [vmem:[#allocation7 + $0x48] sm:$0xff]  ;;  %v336_v55 = vld [vmem:[#allocation7 + $0x50] sm:$0xff]  ;;  %v337_v56 = vld [vmem:[#allocation7 + $0x58] sm:$0xff] }
  0x45   :  { %v754_v54 = vpack.c.bf16 %v335_v53, %v334_v52  ;;  %v758_v57 = vpack.c.bf16 %v337_v56, %v336_v55  ;;  %v338_v58 = vld [vmem:[#allocation7 + $0x60] sm:$0xff]  ;;  %v339_v59 = vld [vmem:[#allocation7 + $0x68] sm:$0xff]  ;;  %v340_v61 = vld [vmem:[#allocation7 + $0x70] sm:$0xff] }
  0x46   :  { %721 = vmatpush3.bf16.msra.mxu0 %v718_v12  ;;  %749 = vmatpush3.bf16.msra.mxu1 %v746_v26  ;;  %v762_v60 = vpack.c.bf16 %v339_v59, %v338_v58  ;;  %v341_v62 = vld [vmem:[#allocation7 + $0x78] sm:$0xff]  ;;  %v993_v0 = vld [vmem:[%s1043_s2] ss:$0 sm:$0xff] }
  0x47   :  { %723 = vmatprep.subr.bf16.mxu0 %v722_v21  ;;  %751 = vmatprep.subr.bf16.mxu1 %v750_v51  ;;  %v766_v63 = vpack.c.bf16 %v341_v62, %v340_v61 }
  0x4a   :  { %725 = vmatpush3.bf16.msra.mxu0 %v722_v21  ;;  %753 = vmatpush3.bf16.msra.mxu1 %v750_v51 }
  0x4b   :  { %727 = vmatprep.subr.bf16.mxu0 %v726_v27  ;;  %755 = vmatprep.subr.bf16.mxu1 %v754_v54 }
  0x4e   :  { %729 = vmatpush3.bf16.msra.mxu0 %v726_v27  ;;  %757 = vmatpush3.bf16.msra.mxu1 %v754_v54 }
  0x4f   :  { %731 = vmatprep.subr.bf16.mxu0 %v730_v30  ;;  %759 = vmatprep.subr.bf16.mxu1 %v758_v57 }
  0x52   :  { %733 = vmatpush3.bf16.msra.mxu0 %v730_v30  ;;  %761 = vmatpush3.bf16.msra.mxu1 %v758_v57 }
  0x53   :  { %735 = vmatprep.subr.bf16.mxu0 %v734_v33  ;;  %763 = vmatprep.subr.bf16.mxu1 %v762_v60 }
  0x56   :  { %737 = vmatpush3.bf16.msra.mxu0 %v734_v33  ;;  %765 = vmatpush3.bf16.msra.mxu1 %v762_v60 }
  0x57   :  { %767 = vmatprep.subr.bf16.mxu1 %v766_v63 }
  0x59   :  { %627 = vmatmul.mubr.f32.vlgmr.msra.gmra.mrb[0].mxu0 %v63_v34 }
  0x5a   :  { %629 = vmatprep.mubr.f32.mxu0 %v64_v35  ;;  %769 = vmatpush3.bf16.msra.mxu1 %v766_v63 }
  0x5d   :  { %630 = vmatmul.mubr.f32.gmra.mrb[2].mxu0 %v65_v36 }
  0x5e   :  { %632 = vmatprep.mubr.f32.mxu0 %v66_v37 }
  0x61   :  { %633 = vmatmul.mubr.f32.gmra.mrb[4].mxu0 %v67_v38 }
  0x62   :  { %635 = vmatprep.mubr.f32.mxu0 %v68_v39 }
  0x65   :  { %636 = vmatmul.mubr.f32.gmra.mrb[6].mxu0 %v69_v40 }
  0x66   :  { %638 = vmatprep.mubr.f32.mxu0 %v70_v41 }
  0x69   :  { %639 = vmatmul.mubr.f32.gmra.mrb[8].mxu0 %v71_v42 }
  0x6a   :  { %641 = vmatprep.mubr.f32.mxu0 %v72_v43 }
  0x6d   :  { %642 = vmatmul.mubr.f32.gmra.mrb[10].mxu0 %v73_v44 }
  0x6e   :  { %644 = vmatprep.mubr.f32.mxu0 %v74_v45 }
  0x71   :  { %645 = vmatmul.mubr.f32.gmra.mrb[12].mxu0 %v75_v46 }
  0x72   :  { %647 = vmatprep.mubr.f32.mxu0 %v76_v47 }
  0x75   :  { %648 = vmatmul.mubr.f32.gmra.mrb[14].mxu0 %v77_v48 }
 0x12c   :  { %v628_v1 = vpop.f32.mrb[0].mxu0 }
 0x12d   :  { %v173_v2 = vadd.f32 %v628_v1, %v993_v0  ;;  %v167_v3 = vpop.f32.mrb[1].mxu0 }
 0x12e   :  { %v168_v4 = vadd.f32 %v993_v0, %v167_v3 }
 0x12f   :  { %v263_v5 = vmul.f32 0.70710677, %v173_v2  ;;  %v247_v33 = vmul.f32 0.5, %v173_v2 }
 0x130   :  { %v262_v6 = vmul.f32 0.70710677, %v168_v4  ;;  %v631_v7 = vpop.f32.mrb[2].mxu0  ;;  %v246_v31 = vmul.f32 0.5, %v168_v4 }
 0x131   :  { %776 = verf.f32 %v263_v5  ;;  %v183_v8 = vadd.f32 %v631_v7, %v993_v0  ;;  %v177_v9 = vpop.f32.mrb[3].mxu0 }
 0x132   :  { %778 = verf.f32 %v262_v6  ;;  %v178_v10 = vadd.f32 %v993_v0, %v177_v9 }
 0x133   :  { %v265_v11 = vmul.f32 0.70710677, %v183_v8  ;;  %v249_v47 = vmul.f32 0.5, %v183_v8 }
 0x134   :  { %v264_v12 = vmul.f32 0.70710677, %v178_v10  ;;  %v634_v13 = vpop.f32.mrb[4].mxu0  ;;  %v248_v43 = vmul.f32 0.5, %v178_v10 }
 0x135   :  { %780 = verf.f32 %v265_v11  ;;  %v193_v14 = vadd.f32 %v634_v13, %v993_v0  ;;  %v187_v15 = vpop.f32.mrb[5].mxu0 }
 0x136   :  { %782 = verf.f32 %v264_v12  ;;  %v188_v16 = vadd.f32 %v993_v0, %v187_v15 }
 0x137   :  { %v267_v17 = vmul.f32 0.70710677, %v193_v14  ;;  %v251_v61 = vmul.f32 0.5, %v193_v14 }
 0x138   :  { %v266_v18 = vmul.f32 0.70710677, %v188_v16  ;;  %v637_v19 = vpop.f32.mrb[6].mxu0  ;;  %v250_v57 = vmul.f32 0.5, %v188_v16 }
 0x139   :  { %784 = verf.f32 %v267_v17  ;;  %v1002_v20 = vadd.f32 %v637_v19, %v993_v0  ;;  %v197_v21 = vpop.f32.mrb[7].mxu0 }
 0x13a   :  { %786 = verf.f32 %v266_v18  ;;  %v198_v22 = vadd.f32 %v993_v0, %v197_v21 }
 0x13b   :  { %v777_v23 = vpop.eup %776  ;;  %v269_v24 = vmul.f32 0.70710677, %v1002_v20  ;;  %v253_v12 = vmul.f32 0.5, %v1002_v20 }
 0x13c   :  { %v779_v25 = vpop.eup %778  ;;  %v295_v26 = vadd.f32 1.0, %v777_v23  ;;  %v268_v27 = vmul.f32 0.70710677, %v198_v22  ;;  %v640_v28 = vpop.f32.mrb[8].mxu0  ;;  %v252_v8 = vmul.f32 0.5, %v198_v22 }
 0x13d   :  { %788 = verf.f32 %v269_v24  ;;  %v1007_v29 = vadd.f32 %v640_v28, %v993_v0  ;;  %v207_v30 = vpop.f32.mrb[9].mxu0  ;;  %v294_v32 = vadd.f32 1.0, %v779_v25 }
 0x13e   :  { %790 = verf.f32 %v268_v27  ;;  %v208_v34 = vadd.f32 %v993_v0, %v207_v30  ;;  %v311_v42 = vmul.f32 %v295_v26, %v247_v33 }
 0x13f   :  { %v781_v35 = vpop.eup %780  ;;  %v271_v36 = vmul.f32 0.70710677, %v1007_v29  ;;  %v310_v37 = vmul.f32 %v294_v32, %v246_v31  ;;  %v255_v24 = vmul.f32 0.5, %v1007_v29 }
 0x140   :  { %v783_v38 = vpop.eup %782  ;;  %v297_v39 = vadd.f32 1.0, %v781_v35  ;;  %v270_v40 = vmul.f32 0.70710677, %v208_v34  ;;  %v643_v41 = vpop.f32.mrb[10].mxu0  ;;  %v254_v22 = vmul.f32 0.5, %v208_v34 }
 0x141   :  { %v296_v44 = vadd.f32 1.0, %v783_v38  ;;  %792 = verf.f32 %v271_v36  ;;  %v1012_v45 = vadd.f32 %v643_v41, %v993_v0  ;;  %v217_v46 = vpop.f32.mrb[11].mxu0  ;;  %682 = vmatprep.mubr.f32.mxu1 %v310_v37 }
 0x142   :  { %794 = verf.f32 %v270_v40  ;;  %v218_v48 = vadd.f32 %v993_v0, %v217_v46  ;;  %683 = vmatmul.mubr.f32.vlgmr.msra.gmra.mrb[0].mxu1 %v311_v42  ;;  %v313_v56 = vmul.f32 %v297_v39, %v249_v47 }
 0x143   :  { %v785_v49 = vpop.eup %784  ;;  %v273_v50 = vmul.f32 0.70710677, %v1012_v45  ;;  %v312_v51 = vmul.f32 %v296_v44, %v248_v43  ;;  %v257_v31 = vmul.f32 0.5, %v1012_v45 }
 0x144   :  { %v787_v52 = vpop.eup %786  ;;  %v299_v53 = vadd.f32 1.0, %v785_v49  ;;  %v272_v54 = vmul.f32 0.70710677, %v218_v48  ;;  %v646_v55 = vpop.f32.mrb[12].mxu0  ;;  %v256_v28 = vmul.f32 0.5, %v218_v48 }
 0x145   :  { %v298_v58 = vadd.f32 1.0, %v787_v52  ;;  %796 = verf.f32 %v273_v50  ;;  %v233_v59 = vadd.f32 %v646_v55, %v993_v0  ;;  %v227_v60 = vpop.f32.mrb[13].mxu0  ;;  %685 = vmatprep.mubr.f32.mxu1 %v312_v51  ;;  %v529_v49 = vld [vmem:[%s1045_s4] ss:$0 sm:$0xff]  ;;  %s907_s4 = smov [#allocation8]  }
 0x146   :  { %798 = verf.f32 %v272_v54  ;;  %v228_v62 = vadd.f32 %v993_v0, %v227_v60  ;;  %686 = vmatmul.mubr.f32.gmra.mrb[2].mxu1 %v313_v56  ;;  %v315_v7 = vmul.f32 %v299_v53, %v251_v61  ;;  %s515_s8 = sshll.u32 %s907_s4, 4  ;;  %s516_s8 = int_to_ptr.vmem [resolvable:$true] %s515_s8 }
 0x147   :  { %v789_v63 = vpop.eup %788  ;;  %v275_v1 = vmul.f32 0.70710677, %v233_v59  ;;  %v314_v2 = vmul.f32 %v298_v58, %v250_v57  ;;  %v259_v38 = vmul.f32 0.5, %v233_v59  ;;  %s874_s9 = scalar_lea.vmem %s516_s8, 2048  ;;  %p879_p11 = scmp.lt.s32.totalorder %s516_s8, %s516_s8 }
 0x148   :  { %v791_v3 = vpop.eup %790  ;;  %v301_v4 = vadd.f32 1.0, %v789_v63  ;;  %v274_v5 = vmul.f32 0.70710677, %v228_v62  ;;  %v649_v6 = vpop.f32.mrb[14].mxu0  ;;  %v258_v37 = vmul.f32 0.5, %v228_v62  ;;  %p875_p10 = scmp.ne.s32.totalorder %s516_s8, %s874_s9  ;;  %p880_p12 = scmp.lt.s32.totalorder %s874_s9, %s874_s9 }
 0x149   :  { %v300_v9 = vadd.f32 1.0, %v791_v3  ;;  %800 = verf.f32 %v275_v1  ;;  %v243_v10 = vadd.f32 %v649_v6, %v993_v0  ;;  %v237_v11 = vpop.f32.mrb[15].mxu0  ;;  %688 = vmatprep.mubr.f32.mxu1 %v314_v2 }
 0x14a   :  { %802 = verf.f32 %v274_v5  ;;  %v238_v13 = vadd.f32 %v993_v0, %v237_v11  ;;  %689 = vmatmul.mubr.f32.gmra.mrb[4].mxu1 %v315_v7  ;;  %v317_v21 = vmul.f32 %v301_v4, %v253_v12  ;;  %p881_p13 = por %p880_p12, %p879_p11 }
 0x14b   :  { %v793_v14 = vpop.eup %792  ;;  %v277_v15 = vmul.f32 0.70710677, %v243_v10  ;;  %v316_v16 = vmul.f32 %v300_v9, %v252_v8  ;;  %v261_v45 = vmul.f32 0.5, %v243_v10 }
 0x14c   :  { %v795_v17 = vpop.eup %794  ;;  %v303_v18 = vadd.f32 1.0, %v793_v14  ;;  %v276_v19 = vmul.f32 0.70710677, %v238_v13  ;;  %v260_v44 = vmul.f32 0.5, %v238_v13  ;;  %p882_p0 = pnand %p881_p13, %p875_p10 }
 0x14d   :  { %v302_v23 = vadd.f32 1.0, %v795_v17  ;;  %804 = verf.f32 %v277_v15  ;;  %691 = vmatprep.mubr.f32.mxu1 %v316_v16 }
 0x14e   :  { %806 = verf.f32 %v276_v19  ;;  %692 = vmatmul.mubr.f32.gmra.mrb[6].mxu1 %v317_v21  ;;  %v319_v27 = vmul.f32 %v303_v18, %v255_v24 }
 0x14f   :  { %v797_v20 = vpop.eup %796  ;;  %v318_v25 = vmul.f32 %v302_v23, %v254_v22 }
 0x150   :  { %v799_v26 = vpop.eup %798  ;;  %v305_v0 = vadd.f32 1.0, %v797_v20 }
 0x151   :  { %v304_v30 = vadd.f32 1.0, %v799_v26  ;;  %694 = vmatprep.mubr.f32.mxu1 %v318_v25 }
 0x152   :  { %695 = vmatmul.mubr.f32.gmra.mrb[8].mxu1 %v319_v27  ;;  %v321_v36 = vmul.f32 %v305_v0, %v257_v31 }
 0x153   :  { %v801_v32 = vpop.eup %800  ;;  %v320_v33 = vmul.f32 %v304_v30, %v256_v28 }
 0x154   :  { %v803_v34 = vpop.eup %802  ;;  %v307_v35 = vadd.f32 1.0, %v801_v32 }
 0x155   :  { %v306_v29 = vadd.f32 1.0, %v803_v34  ;;  %697 = vmatprep.mubr.f32.mxu1 %v320_v33 }
 0x156   :  { %698 = vmatmul.mubr.f32.gmra.mrb[10].mxu1 %v321_v36  ;;  %v323_v43 = vmul.f32 %v307_v35, %v259_v38 }
 0x157   :  { %v805_v39 = vpop.eup %804  ;;  %v322_v40 = vmul.f32 %v306_v29, %v258_v37 }
 0x158   :  { %v807_v41 = vpop.eup %806  ;;  %v309_v42 = vadd.f32 1.0, %v805_v39 }
 0x159   :  { %v308_v46 = vadd.f32 1.0, %v807_v41  ;;  %700 = vmatprep.mubr.f32.mxu1 %v322_v40 }
 0x15a   :  { %701 = vmatmul.mubr.f32.gmra.mrb[12].mxu1 %v323_v43  ;;  %v325_v48 = vmul.f32 %v309_v42, %v261_v45 }
 0x15b   :  { %v324_v47 = vmul.f32 %v308_v46, %v260_v44 }
 0x15d   :  { %703 = vmatprep.mubr.f32.mxu1 %v324_v47 }
 0x15e   :  { %704 = vmatmul.mubr.f32.gmra.mrb[14].mxu1 %v325_v48 }
 0x215   :  { %v684_v50 = vpop.f32.mrb[0].mxu1 }
 0x216   :  { %v421_v51 = vadd.f32 %v684_v50, %v529_v49  ;;  %v415_v52 = vpop.f32.mrb[1].mxu1 }
 0x217   :  { %v416_v53 = vadd.f32 %v529_v49, %v415_v52 }
 0x218   :  { %495 = vst [vmem:[#allocation8 + $0x8] sm:$0xff] %v421_v51 }
 0x219   :  { %494 = vst [vmem:[#allocation8] sm:$0xff] %v416_v53  ;;  %v687_v54 = vpop.f32.mrb[2].mxu1 }
 0x21a   :  { %v431_v55 = vadd.f32 %v687_v54, %v529_v49  ;;  %v425_v56 = vpop.f32.mrb[3].mxu1 }
 0x21b   :  { %v426_v57 = vadd.f32 %v529_v49, %v425_v56 }
 0x21c   :  { %497 = vst [vmem:[#allocation8 + $0x18] sm:$0xff] %v431_v55 }
 0x21d   :  { %496 = vst [vmem:[#allocation8 + $0x10] sm:$0xff] %v426_v57  ;;  %v690_v58 = vpop.f32.mrb[4].mxu1 }
 0x21e   :  { %v441_v59 = vadd.f32 %v690_v58, %v529_v49  ;;  %v435_v60 = vpop.f32.mrb[5].mxu1 }
 0x21f   :  { %v436_v61 = vadd.f32 %v529_v49, %v435_v60 }
 0x220   :  { %499 = vst [vmem:[#allocation8 + $0x28] sm:$0xff] %v441_v59 }
 0x221   :  { %498 = vst [vmem:[#allocation8 + $0x20] sm:$0xff] %v436_v61  ;;  %v693_v62 = vpop.f32.mrb[6].mxu1 }
 0x222   :  { %v451_v63 = vadd.f32 %v693_v62, %v529_v49  ;;  %v445_v1 = vpop.f32.mrb[7].mxu1 }
 0x223   :  { %v446_v2 = vadd.f32 %v529_v49, %v445_v1 }
 0x224   :  { %501 = vst [vmem:[#allocation8 + $0x38] sm:$0xff] %v451_v63 }
 0x225   :  { %500 = vst [vmem:[#allocation8 + $0x30] sm:$0xff] %v446_v2  ;;  %v696_v3 = vpop.f32.mrb[8].mxu1 }
 0x226   :  { %v461_v4 = vadd.f32 %v696_v3, %v529_v49  ;;  %v455_v5 = vpop.f32.mrb[9].mxu1 }
 0x227   :  { %v456_v6 = vadd.f32 %v529_v49, %v455_v5 }
 0x228   :  { %503 = vst [vmem:[#allocation8 + $0x48] sm:$0xff] %v461_v4 }
 0x229   :  { %502 = vst [vmem:[#allocation8 + $0x40] sm:$0xff] %v456_v6  ;;  %v699_v7 = vpop.f32.mrb[10].mxu1 }
 0x22a   :  { %v471_v8 = vadd.f32 %v699_v7, %v529_v49  ;;  %v465_v9 = vpop.f32.mrb[11].mxu1 }
 0x22b   :  { %v466_v10 = vadd.f32 %v529_v49, %v465_v9 }
 0x22c   :  { %505 = vst [vmem:[#allocation8 + $0x58] sm:$0xff] %v471_v8 }
 0x22d   :  { %504 = vst [vmem:[#allocation8 + $0x50] sm:$0xff] %v466_v10  ;;  %v702_v11 = vpop.f32.mrb[12].mxu1 }
 0x22e   :  { %v481_v12 = vadd.f32 %v702_v11, %v529_v49  ;;  %v475_v13 = vpop.f32.mrb[13].mxu1 }
 0x22f   :  { %v476_v14 = vadd.f32 %v529_v49, %v475_v13 }
 0x230   :  { %507 = vst [vmem:[#allocation8 + $0x68] sm:$0xff] %v481_v12 }
 0x231   :  { %506 = vst [vmem:[#allocation8 + $0x60] sm:$0xff] %v476_v14  ;;  %v705_v15 = vpop.f32.mrb[14].mxu1 }
 0x232   :  { %v491_v16 = vadd.f32 %v705_v15, %v529_v49  ;;  %v485_v17 = vpop.f32.mrb[15].mxu1 }
 0x233   :  { %v486_v18 = vadd.f32 %v529_v49, %v485_v17 }
 0x234   :  { %509 = vst [vmem:[#allocation8 + $0x78] sm:$0xff] %v491_v16 }
 0x235   :  { %508 = vst [vmem:[#allocation8 + $0x70] sm:$0xff] %v486_v18 }
 0x236   :  { %885 = shalt.err (!%p882_p0)
}
 0x237   :  { %s886_s12 = scalar_lea.hbm %s1046_s5, 2048 }
 0x238   :  { %p887_p1 = scmp.ne.s32.totalorder %s1046_s5, %s886_s12  ;;  %p890_p2 = scmp.lt.u32.totalorder %s886_s12, %s1046_s5 }
 0x23a   :  { %p892_p3 = pnand %p890_p2, %p887_p1 }
 0x23c   :  { %895 = shalt.err (!%p892_p3)
}
 0x23d   :  { %521 = dma.vmem_to_hbm [thread:$0]  %s516_s8, 2048, %s1046_s5, [#allocation4], %s904_s30, %s904_s30, %s905_s6  }
 0x23e   :  { %900 = dma.done.wait [#allocation4], 2048  }
 0x23f   :  { %901 = vsyncadd [#allocation4], 4294965248 }
 0x240   :  { %525 = vsyncpa [#allocation3], 1 }
 0x241   :  { %526 = vsyncpa [#allocation6], 1 }
 0x242   :  { %527 = vsyncpa [#allocation4], 1 }

</bundles_post_ra>
